<compile_context>
chip_gen: v7x
topology: tpu7x:2x2x1
jax: 0.10.0
libtpu: 0.0.40
codegen_flags: <defaults>
</compile_context>

<pallas_src>
import functools

import jax
import jax.numpy as jnp
from jax.experimental import pallas as pl
from jax.experimental.pallas import tpu as pltpu


def _channel_attention_kernel(w1t_ref, w2_ref, x_ref, o_ref,
                              sum_acc, max_acc, *,
                              spatial_size, block_lanes, acc_width,
                              mask_tail, inv_hw):
    # w1t_ref : VMEM (C, Cr)      fc1 weight, transposed  (fc1: Conv2d(C, Cr, 1))
    # w2_ref  : VMEM (C, Cr)      fc2 weight              (fc2: Conv2d(Cr, C, 1))
    # x_ref   : VMEM (C, T)       one spatial tile of one batch element
    # o_ref   : VMEM (C, 1)       attention weights for this batch element
    # sum_acc : VMEM (C, acc_w)   f32 scratch — lane-dense running spatial sum
    # max_acc : VMEM (C, acc_w)   f32 scratch — lane-dense running spatial max
    s = pl.program_id(1)
    n_s = pl.num_programs(1)

    @pl.when(s == 0)
    def _init():
        sum_acc[...] = jnp.zeros(sum_acc.shape, jnp.float32)
        max_acc[...] = jnp.full(max_acc.shape, -jnp.inf, jnp.float32)

    xt = x_ref[...].astype(jnp.float32)                       # (C, T)

    if mask_tail:
        # cdiv grid: the last tile overhangs the true spatial extent; mask the
        # out-of-range lanes (0 for sum, -inf for max).  For full tiles the
        # selects are identities and the VPU work hides under the tile DMA.
        lane = jax.lax.broadcasted_iota(jnp.int32, (1, block_lanes), 1)
        valid = (s * block_lanes + lane) < spatial_size        # (1, T)
        x_sum = jnp.where(valid, xt, 0.0)
        x_max = jnp.where(valid, xt, -jnp.inf)
    else:
        x_sum = xt
        x_max = xt

    # Lane-dense accumulation: only 128-aligned VPU adds/maxes per step; the
    # cross-lane (XLU) reduce is deferred to the finalize branch.
    s_run = sum_acc[...]
    m_run = max_acc[...]
    n_groups = block_lanes // acc_width
    for g in range(n_groups):
        sl = slice(g * acc_width, (g + 1) * acc_width)
        s_run = s_run + x_sum[:, sl]
        m_run = jnp.maximum(m_run, x_max[:, sl])
    sum_acc[...] = s_run
    max_acc[...] = m_run

    @pl.when(s == n_s - 1)
    def _finalize():
        # Single cross-lane reduce per batch element.
        avg = jnp.sum(sum_acc[...], axis=-1, keepdims=True) * inv_hw   # (C, 1)
        mx = jnp.max(max_acc[...], axis=-1, keepdims=True)             # (C, 1)

        w1t = w1t_ref[...].astype(jnp.float32)                # (C, Cr)
        w2 = w2_ref[...].astype(jnp.float32)                  # (C, Cr)

        # fc1: h[j] = sum_c w1[j, c] * v[c]   (exact f32 on the VPU)
        h_avg = jnp.sum(w1t * avg, axis=0, keepdims=True)     # (1, Cr)
        h_max = jnp.sum(w1t * mx, axis=0, keepdims=True)      # (1, Cr)
        h = jnp.maximum(h_avg, 0.0) + jnp.maximum(h_max, 0.0)  # relu; fc2 is linear

        # fc2: out[c] = sum_j w2[c, j] * h[j]
        out = jnp.sum(w2 * h, axis=1, keepdims=True)          # (C, 1)
        o_ref[...] = jax.nn.sigmoid(out).astype(o_ref.dtype)


def _pick_spatial_tile(S, C, itemsize, target_bytes=4 * 1024 * 1024,
                       max_lanes=128 * 128):
    """Spatial (lane) tile size.

    - S <= 128: full extent (always legal, single step, no masking).
    - S  > 128: a multiple of 128, capped so the (C, T) block stays ~<= 4 MiB
      and the per-step lane-group unroll stays bounded (<= 128 groups).
      The grid is cdiv(S, T); the tail is masked in-kernel.
    """
    if S <= 128:
        return S
    cap = (target_bytes // max(1, C * itemsize)) // 128 * 128
    cap = max(128, min(cap, max_lanes))
    s_up = ((S + 127) // 128) * 128
    return min(cap, s_up)


def channel_attention(x, w1, w2, *, spatial_tile_bytes=4 * 1024 * 1024):
    """x: [B, C, H, W]; w1: [Cr, C] (fc1 1x1 conv); w2: [C, Cr] (fc2 1x1 conv).
    Returns sigmoid channel-attention weights of shape [B, C, 1, 1].

    Feeding bf16 `x` halves HBM traffic (the kernel accumulates in f32)."""
    B, C, H, W = x.shape
    Cr = w1.shape[0]
    S = H * W
    x_item = jnp.dtype(x.dtype).itemsize
    T = _pick_spatial_tile(S, C, x_item, target_bytes=spatial_tile_bytes)
    n_s = pl.cdiv(S, T)
    acc_w = min(T, 128)
    mask_tail = (S % T) != 0

    x2 = x.reshape(B, C, S)                # free: NCHW is contiguous over H*W
    w1t = jnp.transpose(w1)                # (C, Cr) — tiny, host/XLA side

    kernel = functools.partial(
        _channel_attention_kernel,
        spatial_size=S, block_lanes=T, acc_width=acc_w,
        mask_tail=mask_tail, inv_hw=1.0 / float(S))

    # Scoped-VMEM estimate: x double-buffer + both weights (double-buffered) +
    # f32 scratch + output.  Only raise the limit if we'd exceed the smallest
    # per-generation default (v5e: 16 MiB scoped).
    w_item = jnp.dtype(w1.dtype).itemsize
    vmem_need = (2 * C * T * x_item
                 + 2 * 2 * C * Cr * w_item
                 + 2 * C * acc_w * 4
                 + 2 * C * x_item)
    vmem_limit = int(vmem_need * 5 // 4) if vmem_need > (15 << 20) else None

    out = pl.pallas_call(
        kernel,
        out_shape=jax.ShapeDtypeStruct((B, C, 1), x.dtype),
        grid_spec=pltpu.PrefetchScalarGridSpec(
            num_scalar_prefetch=0,
            grid=(B, n_s),
            in_specs=[
                pl.BlockSpec((C, Cr), lambda b, s: (0, 0)),            # w1.T
                pl.BlockSpec((C, Cr), lambda b, s: (0, 0)),            # w2
                pl.BlockSpec((pl.Squeezed(), C, T), lambda b, s: (b, 0, s)),
            ],
            out_specs=pl.BlockSpec((pl.Squeezed(), C, 1), lambda b, s: (b, 0, 0)),
            scratch_shapes=[
                pltpu.VMEM((C, acc_w), jnp.float32),   # running sum (lane-dense)
                pltpu.VMEM((C, acc_w), jnp.float32),   # running max (lane-dense)
            ],
        ),
        compiler_params=pltpu.CompilerParams(
            dimension_semantics=("parallel", "arbitrary"),
            vmem_limit_bytes=vmem_limit),
    )(w1t, w2, x2)
    return out.reshape(B, C, 1, 1)


def channel_attention_ref(x, w1, w2):
    """Pure-JAX reference mirroring the PyTorch forward."""
    avg = jnp.mean(x, axis=(2, 3))                        # (B, C)
    mx = jnp.max(x, axis=(2, 3))                          # (B, C)
    hp = jax.lax.Precision.HIGHEST

    def mlp(v):
        h = jax.nn.relu(jnp.dot(v, w1.T, precision=hp))   # (B, Cr)
        return jnp.dot(h, w2.T, precision=hp)             # (B, C)

    out = jax.nn.sigmoid(mlp(avg) + mlp(mx))              # (B, C)
    return out.reshape(out.shape[0], out.shape[1], 1, 1)


def _check(x, w1, w2, **kw):
    out = jax.block_until_ready(channel_attention(x, w1, w2, **kw))
    ref = channel_attention_ref(x, w1, w2)
    assert out.shape == ref.shape
    err = float(jnp.max(jnp.abs(out - ref)))
    assert jnp.allclose(out, ref, atol=1e-5, rtol=1e-5), err


if __name__ == "__main__":
    key = jax.random.PRNGKey(0)
    kx, k1, k2, kx2, kx3 = jax.random.split(key, 5)

    # Shapes consistent with the module: reduction_ratio=16 needs C >= 16.
    B, C = 2, 32
    reduction_ratio = 16
    Cr = C // reduction_ratio                             # 2

    # nn.Conv2d(C, Cr, 1, bias=False) / nn.Conv2d(Cr, C, 1, bias=False) weights.
    b1 = 1.0 / (C ** 0.5)
    b2 = 1.0 / (Cr ** 0.5)
    w1 = jax.random.uniform(k1, (Cr, C), jnp.float32, -b1, b1)
    w2 = jax.random.uniform(k2, (C, Cr), jnp.float32, -b2, b2)

    # 1) H*W divisible by 128 (multi lane-group accumulate, no tail mask).
    x = jax.random.normal(kx, (B, C, 16, 16), dtype=jnp.float32)
    _check(x, w1, w2)

    # 2) Realistic non-128-divisible spatial (14x14 = 196): single overhanging
    #    block, tail lanes masked (0 for sum, -inf for max).
    x2 = jax.random.normal(kx2, (1, C, 14, 14), dtype=jnp.float32)
    _check(x2, w1, w2)

    # 3) Multi-tile cdiv grid with a ragged tail (forced tiny tile: 400 lanes
    #    over 4 steps of 128), exercising the running accumulators + tail mask.
    x3 = jax.random.normal(kx3, (B, C, 20, 20), dtype=jnp.float32)
    _check(x3, w1, w2, spatial_tile_bytes=16 * 1024)

    print("KERNEL_OK")
</pallas_src>

<mosaic_0001>
module attributes {stable_mosaic.version = 11 : i64} {
  func.func @_channel_attention_kernel(%arg0: i32, %arg1: i32, %arg2: memref<32x2xf32, #tpu.memory_space<vmem>>, %arg3: memref<32x2xf32, #tpu.memory_space<vmem>>, %arg4: memref<1x32x256xf32, #tpu.memory_space<vmem>>, %arg5: memref<1x32x1xf32, #tpu.memory_space<vmem>>, %arg6: memref<32x128xf32, #tpu.memory_space<vmem>>, %arg7: memref<32x128xf32, #tpu.memory_space<vmem>>) attributes {dimension_semantics = [#tpu.dimension_semantics<parallel>, #tpu.dimension_semantics<arbitrary>], iteration_bounds = array<i64: 2, 1>, scalar_prefetch = 0 : i64, scratch_operands = 2 : i64, tpu.core_type = #tpu.core_type<tc>, window_params = [{pipeline_mode = #tpu.pipeline_mode<synchronous>, transform_indices = @transform_0, window_bounds = array<i64: 32, 2>}, {pipeline_mode = #tpu.pipeline_mode<synchronous>, transform_indices = @transform_1, window_bounds = array<i64: 32, 2>}, {transform_indices = @transform_2, window_bounds = array<i64: 1, 32, 256>}, {transform_indices = @transform_3, window_bounds = array<i64: 1, 32, 1>}]} {
    %c0_i32 = arith.constant 0 : i32
    %0 = arith.cmpi eq, %arg1, %c0_i32 : i32
    %1 = arith.extui %0 : i1 to i32
    %c0_i32_0 = arith.constant 0 : i32
    %2 = arith.cmpi ne, %1, %c0_i32_0 : i32
    scf.if %2 {
      %cst = arith.constant 0.000000e+00 : f32
      %20 = vector.broadcast %cst : f32 to vector<32x128xf32>
      %c0_13 = arith.constant 0 : index
      %c0_14 = arith.constant 0 : index
      %21 = vector.load %arg6[%c0_13, %c0_14] : memref<32x128xf32, #tpu.memory_space<vmem>>, vector<32x128xf32>
      tpu.vector_store %arg6[%c0_13, %c0_14], %20 {strides = array<i32>} : memref<32x128xf32, #tpu.memory_space<vmem>>, vector<32x128xf32>,
      %cst_15 = arith.constant 0xFF800000 : f32
      %22 = vector.broadcast %cst_15 : f32 to vector<32x128xf32>
      %c0_16 = arith.constant 0 : index
      %c0_17 = arith.constant 0 : index
      %23 = vector.load %arg7[%c0_16, %c0_17] : memref<32x128xf32, #tpu.memory_space<vmem>>, vector<32x128xf32>
      tpu.vector_store %arg7[%c0_16, %c0_17], %22 {strides = array<i32>} : memref<32x128xf32, #tpu.memory_space<vmem>>, vector<32x128xf32>,
    } else {
    }
    %c0 = arith.constant 0 : index
    %c0_1 = arith.constant 0 : index
    %c0_2 = arith.constant 0 : index
    %3 = vector.load %arg4[%c0, %c0_1, %c0_2] : memref<1x32x256xf32, #tpu.memory_space<vmem>>, vector<1x32x256xf32>
    %4 = vector.shape_cast %3 : vector<1x32x256xf32> to vector<32x256xf32>
    %c0_3 = arith.constant 0 : index
    %c0_4 = arith.constant 0 : index
    %5 = vector.load %arg6[%c0_3, %c0_4] : memref<32x128xf32, #tpu.memory_space<vmem>>, vector<32x128xf32>
    %c0_5 = arith.constant 0 : index
    %c0_6 = arith.constant 0 : index
    %6 = vector.load %arg7[%c0_5, %c0_6] : memref<32x128xf32, #tpu.memory_space<vmem>>, vector<32x128xf32>
    %7 = vector.extract_strided_slice %4 {offsets = [0, 0], sizes = [32, 128], strides = [1, 1]} : vector<32x256xf32> to vector<32x128xf32>
    %8 = arith.addf %5, %7 : vector<32x128xf32>
    %9 = vector.extract_strided_slice %4 {offsets = [0, 0], sizes = [32, 128], strides = [1, 1]} : vector<32x256xf32> to vector<32x128xf32>
    %10 = arith.maximumf %6, %9 : vector<32x128xf32>
    %11 = vector.extract_strided_slice %4 {offsets = [0, 128], sizes = [32, 128], strides = [1, 1]} : vector<32x256xf32> to vector<32x128xf32>
    %12 = arith.addf %8, %11 : vector<32x128xf32>
    %13 = vector.extract_strided_slice %4 {offsets = [0, 128], sizes = [32, 128], strides = [1, 1]} : vector<32x256xf32> to vector<32x128xf32>
    %14 = arith.maximumf %10, %13 : vector<32x128xf32>
    %c0_7 = arith.constant 0 : index
    %c0_8 = arith.constant 0 : index
    %15 = vector.load %arg6[%c0_7, %c0_8] : memref<32x128xf32, #tpu.memory_space<vmem>>, vector<32x128xf32>
    tpu.vector_store %arg6[%c0_7, %c0_8], %12 {strides = array<i32>} : memref<32x128xf32, #tpu.memory_space<vmem>>, vector<32x128xf32>,
    %c0_9 = arith.constant 0 : index
    %c0_10 = arith.constant 0 : index
    %16 = vector.load %arg7[%c0_9, %c0_10] : memref<32x128xf32, #tpu.memory_space<vmem>>, vector<32x128xf32>
    tpu.vector_store %arg7[%c0_9, %c0_10], %14 {strides = array<i32>} : memref<32x128xf32, #tpu.memory_space<vmem>>, vector<32x128xf32>,
    %c0_i32_11 = arith.constant 0 : i32
    %17 = arith.cmpi eq, %arg1, %c0_i32_11 : i32
    %18 = arith.extui %17 : i1 to i32
    %c0_i32_12 = arith.constant 0 : i32
    %19 = arith.cmpi ne, %18, %c0_i32_12 : i32
    scf.if %19 {
      %c0_13 = arith.constant 0 : index
      %c0_14 = arith.constant 0 : index
      %20 = vector.load %arg6[%c0_13, %c0_14] : memref<32x128xf32, #tpu.memory_space<vmem>>, vector<32x128xf32>
      %cst = arith.constant dense<0.000000e+00> : vector<32xf32>
      %21 = vector.multi_reduction <add>, %20, %cst [1] : vector<32x128xf32> to vector<32xf32>
      %22 = vector.shape_cast %21 : vector<32xf32> to vector<32x1xf32>
      %cst_15 = arith.constant 3.906250e-03 : f32
      %23 = vector.broadcast %cst_15 : f32 to vector<32x1xf32>
      %24 = arith.mulf %22, %23 : vector<32x1xf32>
      %c0_16 = arith.constant 0 : index
      %c0_17 = arith.constant 0 : index
      %25 = vector.load %arg7[%c0_16, %c0_17] : memref<32x128xf32, #tpu.memory_space<vmem>>, vector<32x128xf32>
      %cst_18 = arith.constant dense<0xFF800000> : vector<32xf32>
      %26 = vector.multi_reduction <maximumf>, %25, %cst_18 [1] : vector<32x128xf32> to vector<32xf32>
      %27 = vector.shape_cast %26 : vector<32xf32> to vector<32x1xf32>
      %c0_19 = arith.constant 0 : index
      %c0_20 = arith.constant 0 : index
      %28 = vector.load %arg2[%c0_19, %c0_20] : memref<32x2xf32, #tpu.memory_space<vmem>>, vector<32x2xf32>
      %c0_21 = arith.constant 0 : index
      %c0_22 = arith.constant 0 : index
      %29 = vector.load %arg3[%c0_21, %c0_22] : memref<32x2xf32, #tpu.memory_space<vmem>>, vector<32x2xf32>
      %30 = vector.broadcast %24 : vector<32x1xf32> to vector<32x2xf32>
      %31 = arith.mulf %28, %30 : vector<32x2xf32>
      %cst_23 = arith.constant dense<0.000000e+00> : vector<2xf32>
      %32 = vector.multi_reduction <add>, %31, %cst_23 [0] : vector<32x2xf32> to vector<2xf32>
      %33 = vector.shape_cast %32 : vector<2xf32> to vector<1x2xf32>
      %34 = vector.broadcast %27 : vector<32x1xf32> to vector<32x2xf32>
      %35 = arith.mulf %28, %34 : vector<32x2xf32>
      %cst_24 = arith.constant dense<0.000000e+00> : vector<2xf32>
      %36 = vector.multi_reduction <add>, %35, %cst_24 [0] : vector<32x2xf32> to vector<2xf32>
      %37 = vector.shape_cast %36 : vector<2xf32> to vector<1x2xf32>
      %cst_25 = arith.constant 0.000000e+00 : f32
      %38 = vector.broadcast %cst_25 : f32 to vector<1x2xf32>
      %39 = arith.maximumf %33, %38 : vector<1x2xf32>
      %cst_26 = arith.constant 0.000000e+00 : f32
      %40 = vector.broadcast %cst_26 : f32 to vector<1x2xf32>
      %41 = arith.maximumf %37, %40 : vector<1x2xf32>
      %42 = arith.addf %39, %41 : vector<1x2xf32>
      %43 = vector.broadcast %42 : vector<1x2xf32> to vector<32x2xf32>
      %44 = arith.mulf %29, %43 : vector<32x2xf32>
      %cst_27 = arith.constant dense<0.000000e+00> : vector<32xf32>
      %45 = vector.multi_reduction <add>, %44, %cst_27 [1] : vector<32x2xf32> to vector<32xf32>
      %46 = vector.shape_cast %45 : vector<32xf32> to vector<32x1xf32>
      %47 = arith.negf %46 : vector<32x1xf32>
      %48 = math.exp %47 : vector<32x1xf32>
      %cst_28 = arith.constant 1.000000e+00 : f32
      %49 = vector.broadcast %cst_28 : f32 to vector<32x1xf32>
      %50 = arith.addf %49, %48 : vector<32x1xf32>
      %51 = arith.divf %49, %50 : vector<32x1xf32>
      %c0_29 = arith.constant 0 : index
      %c0_30 = arith.constant 0 : index
      %c0_31 = arith.constant 0 : index
      %52 = vector.load %arg5[%c0_29, %c0_30, %c0_31] : memref<1x32x1xf32, #tpu.memory_space<vmem>>, vector<1x32x1xf32>
      %53 = vector.shape_cast %52 : vector<1x32x1xf32> to vector<32x1xf32>
      %54 = vector.shape_cast %51 : vector<32x1xf32> to vector<1x32x1xf32>
      tpu.vector_store %arg5[%c0_29, %c0_30, %c0_31], %54 {strides = array<i32>} : memref<1x32x1xf32, #tpu.memory_space<vmem>>, vector<1x32x1xf32>,
    } else {
    }
    return
  }
  func.func @transform_0(%arg0: i32, %arg1: i32) -> (i32, i32) {
    %c0_i32 = arith.constant 0 : i32
    %c0_i32_0 = arith.constant 0 : i32
    %c0_i32_1 = arith.constant 0 : i32
    return %c0_i32, %c0_i32_0 : i32, i32
  }
  func.func @transform_1(%arg0: i32, %arg1: i32) -> (i32, i32) {
    %c0_i32 = arith.constant 0 : i32
    %c0_i32_0 = arith.constant 0 : i32
    %c0_i32_1 = arith.constant 0 : i32
    return %c0_i32, %c0_i32_0 : i32, i32
  }
  func.func @transform_2(%arg0: i32, %arg1: i32) -> (i32, i32, i32) {
    %c0_i32 = arith.constant 0 : i32
    %c0_i32_0 = arith.constant 0 : i32
    return %arg0, %c0_i32, %arg1 : i32, i32, i32
  }
  func.func @transform_3(%arg0: i32, %arg1: i32) -> (i32, i32, i32) {
    %c0_i32 = arith.constant 0 : i32
    %c0_i32_0 = arith.constant 0 : i32
    %c0_i32_1 = arith.constant 0 : i32
    return %arg0, %c0_i32, %c0_i32_0 : i32, i32, i32
  }
}

</mosaic_0001>

<bundles_post_ra>
// kernel: tpu_custom_call.1
= control target key start
LH: loop header
LB: loop body
LE: loop exit
PB: predicated region body
PF: predicated region fallthrough
CT: control target
= control target key end

     0   :  { %8 = vsyncpa [#allocation5], 0  ;;  %s817_s0 = inlined_call_operand.vmem [shape: f32[32,2], index: 0, kind: input, shape index: {}]   ;;  %s818_s1 = inlined_call_operand.vmem [shape: f32[32,2], index: 1, kind: input, shape index: {}]   ;;  %s819_s2 = inlined_call_operand.hbm [shape: f32[2,32,256], index: 2, kind: input, shape index: {}]   ;;  %s820_s3 = inlined_call_operand.vmem [shape: f32[2,32,1], index: 3, kind: output, shape index: {}]  }
   0x1   :  { %10 = vsyncpa [#allocation5 + $0x1], 0  ;;  %s657_s12 = smov 0   ;;  %s659_s13 = smov 0  }
   0x2   :  { %s661_s14 = smov 0   ;;  %s663_s15 = smov 0  }
   0x3   :  { %s665_s16 = smov 0   ;;  %s667_s17 = smov 0  }
   0x4 LB: > { %s460_s18 = sadd.s32 4294967295, %s632_s17   ;;  %s28_s19 = sadd.s32 1, %s628_s16  ;;  %s632_s17 = sphi %s667_s17, %s16_s17   ;;  %s628_s16 = sphi %s665_s16, %s828_s16   ;;  %s624_s15 = sphi %s663_s15, %s827_s15   ;;  %s620_s14 = sphi %s661_s14, %s826_s14   ;;  %s616_s13 = sphi %s659_s13, %s825_s13   ;;  %s612_s12 = sphi %s657_s12, %s824_s12  }
   0x5   : > { %p30_p0 = scmp.ge.s32.totalorder %s28_s19, 2  ;;  %s79_s20 = sadd.s32 1, %s620_s14 }
   0x6   : > { %p86_p1 = scmp.ne.s32.totalorder %s620_s14, %s616_s13  ;;  %p87_p2 = scmp.eq.s32.totalorder %s632_s17, 0 }
   0x7   : > { %s830_s19 = smov (%p30_p0, %s28_s19), 0  ;;  %p92_p4 = scmp.ne.s32.totalorder %s616_s13, %s612_s12 }
   0x8   : > { %p693_p3 = por %p87_p2, %p86_p1  ;;  %s74_s22 = ssub.s32 %s628_s16, %s830_s19 }
   0x9   : > { %p93_p5 = scmp.eq.s32.totalorder %s460_s18, 0  ;;  %p77_p6 = scmp.eq.s32.totalorder %s74_s22, 0 }
   0xa   : > { %p485_p8 = scmp.lt.s32.totalorder %s632_s17, 2  ;;  %s148_s25 = sand.u32 1, %s620_s14  }
   0xb   : > { %p700_p7 = por %p93_p5, %p92_p4  ;;  %s477_s26 = sshll.u32 %s628_s16, 10 }
   0xc   : > { %s706_s24 = scalar_select %p77_p6, %s620_s14, %s79_s20  }
   0xd   : > { %s464_s27 = sshll.u32 %s148_s25, 6  ;;  %s713_s30 = scalar_lea.hbm %s819_s2, %s477_s26 }
   0xe   : > { %s152_s4 = scalar_lea.vmem [#allocation4], %s464_s27  ;;  %p717_p9 = pnand %p485_p8, %p693_p3 }
   0xf   : > { %s161_s5 = sshll.u32 %s152_s4, 4  ;;  %s723_s7 = scalar_lea.sflag [#allocation5], %s148_s25  ;;  %s721_s5 = int_to_ptr.vmem [resolvable:$true] %s161_s5 }
  0x10   : > { %s552_s8 = scalar_lea.hbm %s713_s30, 1024  ;;  %p554_p11 = pneg %p717_p9 }
  0x11   : > { %p553_p10 = scmp.ne.s32.totalorder %s713_s30, %s552_s8  ;;  %s557_s11 = scalar_lea.hbm %s819_s2, 2048 }
  0x12   : > { %p558_p0 = scmp.lt.u32.totalorder %s713_s30, %s819_s2  ;;  %p559_p1 = scmp.lt.u32.totalorder %s557_s11, %s552_s8 }
  0x13   : > { %p555_p12 = pnand %p554_p11, %p553_p10  ;;  %p561_p3 = scmp.lt.u32.totalorder %s552_s8, %s713_s30 }
  0x14   : > { %p560_p2 = por %p559_p1, %p558_p0 }
  0x15   : > { %p556_p13 = pneg %p555_p12 }
  0x16   : > { %p562_p4 = por %p561_p3, %p560_p2 }
  0x18   : > { %p563_p5 = pnand %p562_p4, %p556_p13 }
  0x1a   : > { %566 = shalt.err (!%p563_p5)
}
  0x1b   : > { %s567_s20 = scalar_lea.vmem %s721_s5, 1024  ;;  %s634_s21 = smov [#allocation4]  }
  0x1c   : > { %p568_p6 = scmp.ne.s32.totalorder %s721_s5, %s567_s20  ;;  %s572_s22 = sshll.u32 %s634_s21, 4  ;;  %s573_s22 = int_to_ptr.vmem [resolvable:$false] %s572_s22 }
  0x1d   : > { %s574_s25 = scalar_lea.vmem %s573_s22, 2048  ;;  %p575_p12 = scmp.lt.s32.totalorder %s721_s5, %s573_s22 }
  0x1e   : > { %p570_p8 = pnand %p568_p6, %p554_p11  ;;  %p576_p0 = scmp.lt.s32.totalorder %s574_s25, %s567_s20 }
  0x20   : > { %p571_p10 = pneg %p570_p8  ;;  %p577_p1 = por %p576_p0, %p575_p12 }
  0x22   : > { %p578_p2 = pnand %p577_p1, %p571_p10 }
  0x24   : > { %581 = shalt.err (!%p578_p2)
}
  0x25   : > { %s635_s26 = smov 256   ;;  %s636_s27 = smov 16  }
  0x26   : > { %484 = dma.hbm_to_vmem [thread:$0]  (!%p717_p9), %s713_s30, 1024, %s721_s5, %s723_s7, %s635_s26, %s635_s26, %s636_s27  }
  0x27   : > { %p467_p11 = scmp.ge.s32.totalorder %s632_s17, 1  ;;  %p169_p13 = scmp.lt.s32.totalorder %s632_s17, 3 }
  0x29   : > { %p170_p3 = pnand %p467_p11, %p169_p13 }
  0x2a   : > { %s175_s28 = sand.u32 (!%p170_p3), 1, %s616_s13  }
  0x2b   : > { %173 = sbr.rel (%p170_p3) target bundleno = 409 (0x199), region = 32  ;;  %s468_s29 = sshll.u32 (!%p170_p3), %s175_s28, 6 }
  0x2c   : > { %s176_s4 = scalar_lea.sflag (!%p170_p3), [#allocation5], %s175_s28  ;;  %s179_s8 = scalar_lea.vmem (!%p170_p3), [#allocation4], %s468_s29 }
  0x32   : > { %607 = dma.done.wait (%p700_p7), %s176_s4, 1024  }
  0x33   : > { %609 = vsyncadd (%p700_p7), %s176_s4, 4294966272  ;;  %v224_v0 = vld [vmem:[%s179_s8 + $0x20] sm:$0xff]  ;;  %v225_v1 = vld [vmem:[%s179_s8 + $0x28] sm:$0xff]  ;;  %vm303_vm0 = vcmask 15360   ;;  %p203_p7 = scmp.lt.s32.totalorder %s624_s15, 1  ;;  %vm377_vm1 = vcmask 7168  }
  0x34   : > { %v220_v2 = vld [vmem:[%s179_s8] sm:$0xff]  ;;  %v246_v3 = vadd.f32 %v225_v1, %v224_v0  ;;  %v221_v4 = vld [vmem:[%s179_s8 + $0x8] sm:$0xff]  ;;  %v222_v5 = vld [vmem:[%s179_s8 + $0x10] sm:$0xff]  ;;  %v250_v15 = vmax.f32 %v224_v0, %v225_v1 }
  0x35   : > { %v223_v6 = vld [vmem:[%s179_s8 + $0x18] sm:$0xff]  ;;  %v244_v7 = vadd.f32 %v221_v4, %v220_v2  ;;  %v248_v8 = vmax.f32 %v220_v2, %v221_v4  ;;  %v226_v10 = vld [vmem:[%s179_s8 + $0x30] sm:$0xff]  ;;  %v291_v19 = vld [vmem:[%s817_s0] sm:$0xff]  ;;  %s832_s15 = smov (!%p203_p7, %s624_s15), 1 }
  0x36   : > { %271 = vadd.xlane.f32.xlu1 %v246_v3  ;;  %v245_v9 = vadd.f32 %v223_v6, %v222_v5  ;;  %v227_v11 = vld [vmem:[%s179_s8 + $0x38] sm:$0xff]  ;;  %v249_v13 = vmax.f32 %v222_v5, %v223_v6  ;;  %v292_v23 = vld [vmem:[%s817_s0 + $0x8] sm:$0xff]  ;;  %v293_v24 = vld [vmem:[%s817_s0 + $0x10] sm:$0xff]  ;;  %s478_s28 = sshll.u32 %s832_s15, 5 }
  0x37   : > { %267 = vadd.xlane.f32.xlu0 %v244_v7  ;;  %v247_v12 = vadd.f32 %v227_v11, %v226_v10  ;;  %v251_v14 = vmax.f32 %v226_v10, %v227_v11  ;;  %v294_v30 = vld [vmem:[%s817_s0 + $0x18] sm:$0xff]  ;;  %v296_v4 = vld [vmem:[%s818_s1 + $0x8] sm:$0xff]  ;;  %v295_v5 = vld [vmem:[%s818_s1] sm:$0xff]  ;;  %s207_s8 = scalar_lea.vmem %s820_s3, %s478_s28 }
  0x38   : > { %v298_v7 = vld [vmem:[%s818_s1 + $0x18] sm:$0xff] }
  0x3a   : > { %283 = vmax.xlane.f32.xlu1 %v248_v8  ;;  %v297_v8 = vld [vmem:[%s818_s1 + $0x10] sm:$0xff] }
  0x3b   : > { %269 = vadd.xlane.f32.xlu0 %v245_v9 }
  0x3e   : > { %273 = vadd.xlane.f32.xlu1 %v247_v12 }
  0x3f   : > { %285 = vmax.xlane.f32.xlu0 %v249_v13 }
  0x42   : > { %289 = vmax.xlane.f32.xlu1 %v251_v14 }
  0x43   : > { %287 = vmax.xlane.f32.xlu0 %v250_v15 }
  0xc3   : > { %v272_v16 = vpop.xlane.xlu1 %271 }
  0xc4   : > { %v268_v17 = vpop.xlane.xlu0 %267  ;;  %v277_v20 = vmul.f32 0.00390625, %v272_v16 }
  0xc5   : > { %v275_v18 = vmul.f32 0.00390625, %v268_v17 }
  0xc6   : > { %v301_v29 = vmul.f32 %v293_v24, %v277_v20 }
  0xc7   : > { %v284_v21 = vpop.xlane.xlu1 %283  ;;  %v299_v25 = vmul.f32 %v291_v19, %v275_v18 }
  0xc8   : > { %v270_v22 = vpop.xlane.xlu0 %269  ;;  %v317_v34 = vmul.f32 %v291_v19, %v284_v21  ;;  %v307_v40 = vsel %vm303_vm0, %v301_v29, 0.0 }
  0xc9   : > { %v276_v26 = vmul.f32 0.00390625, %v270_v22  ;;  %v304_v33 = vsel %vm303_vm0, %v299_v25, 0.0 }
  0xca   : > { %v321_v46 = vsel %vm303_vm0, %v317_v34, 0.0 }
  0xcb   : > { %v274_v27 = vpop.xlane.xlu1 %273  ;;  %v300_v28 = vmul.f32 %v292_v23, %v276_v26 }
  0xcc   : > { %v278_v31 = vmul.f32 0.00390625, %v274_v27  ;;  %v286_v32 = vpop.xlane.xlu0 %285 }
  0xcd   : > { %v305_v35 = vsel %vm303_vm0, %v300_v28, 0.0  ;;  %v318_v36 = vmul.f32 %v292_v23, %v286_v32 }
  0xce   : > { %v306_v37 = vadd.f32 %v305_v35, %v304_v33  ;;  %v302_v38 = vmul.f32 %v294_v30, %v278_v31 }
  0xcf   : > { %v322_v39 = vsel %vm303_vm0, %v318_v36, 0.0  ;;  %v290_v41 = vpop.xlane.xlu1 %289 }
  0xd0   : > { %v308_v42 = vadd.f32 %v307_v40, %v306_v37  ;;  %v288_v43 = vpop.xlane.xlu0 %287  ;;  %v309_v44 = vsel %vm303_vm0, %v302_v38, 0.0  ;;  %v320_v45 = vmul.f32 %v294_v30, %v290_v41  ;;  %v323_v48 = vadd.f32 %v322_v39, %v321_v46 }
  0xd1   : > { %v319_v47 = vmul.f32 %v293_v24, %v288_v43 }
  0xd2   : > { %v310_v49 = vadd.f32 %v309_v44, %v308_v42  ;;  %v326_v51 = vsel %vm303_vm0, %v320_v45, 0.0 }
  0xd3   : > { %v324_v50 = vsel %vm303_vm0, %v319_v47, 0.0 }
  0xd4   : > { %v325_v52 = vadd.f32 %v324_v50, %v323_v48  ;;  %v311_v53 = vrot.slane %v310_v49, 4 }
  0xd6   : > { %v312_v54 = vadd.f32 %v311_v53, %v310_v49  ;;  %v327_v55 = vadd.f32 %v326_v51, %v325_v52 }
  0xd8   : > { %v313_v56 = vrot.slane %v312_v54, 2  ;;  %v328_v57 = vrot.slane %v327_v55, 4 }
  0xda   : > { %v314_v58 = vadd.f32 %v313_v56, %v312_v54  ;;  %v329_v59 = vadd.f32 %v328_v57, %v327_v55 }
  0xdc   : > { %v315_v60 = vrot.slane %v314_v58, 1  ;;  %v330_v61 = vrot.slane %v329_v59, 2 }
  0xde   : > { %v331_v62 = vadd.f32 %v330_v61, %v329_v59  ;;  %v316_v63 = vadd.f32 %v315_v60, %v314_v58 }
  0xe0   : > { %v332_v0 = vrot.slane %v331_v62, 1  ;;  %v334_v2 = vmax.f32 %v316_v63, 0.0 }
  0xe2   : > { %v333_v1 = vadd.f32 %v332_v0, %v331_v62 }
  0xe4   : > { %v335_v3 = vmax.f32 %v333_v1, 0.0 }
  0xe6   : > { %v336_v6 = vadd.f32 %v335_v3, %v334_v2 }
  0xe8   : > { %v338_v9 = vmul.f32 %v336_v6, %v296_v4  ;;  %v337_v10 = vmul.f32 %v336_v6, %v295_v5  ;;  %v340_v13 = vmul.f32 %v336_v6, %v298_v7  ;;  %v339_v14 = vmul.f32 %v336_v6, %v297_v8 }
  0xea   : > { %v344_v11 = vsel %vm303_vm0, %v338_v9, 0.0  ;;  %v341_v12 = vsel %vm303_vm0, %v337_v10, 0.0  ;;  %v350_v15 = vsel %vm303_vm0, %v340_v13, 0.0  ;;  %v347_v16 = vsel %vm303_vm0, %v339_v14, 0.0 }
  0xeb   : > { %345 = vadd.xlane.f32.xlu1 %v344_v11  ;;  %342 = vadd.xlane.f32.xlu0 %v341_v12 }
  0xef   : > { %351 = vadd.xlane.f32.xlu1 %v350_v15  ;;  %348 = vadd.xlane.f32.xlu0 %v347_v16 }
 0x178   : > { %v346_v17 = vpop.xlane.xlu1 %345  ;;  %v343_v18 = vpop.xlane.xlu0 %342 }
 0x179   : > { %v472_v19 = vmul.f32 -1.442695, %v346_v17  ;;  %v471_v20 = vmul.f32 -1.442695, %v343_v18 }
 0x17b   : > { %536 = vpow2.f32 %v472_v19 }
 0x17c   : > { %538 = vpow2.f32 %v471_v20  ;;  %v352_v21 = vpop.xlane.xlu1 %351  ;;  %v349_v22 = vpop.xlane.xlu0 %348 }
 0x17d   : > { %v474_v23 = vmul.f32 -1.442695, %v352_v21  ;;  %v473_v24 = vmul.f32 -1.442695, %v349_v22 }
 0x17f   : > { %540 = vpow2.f32 %v474_v23 }
 0x180   : > { %542 = vpow2.f32 %v473_v24 }
 0x185   : > { %v537_v25 = vpop.eup %536 }
 0x186   : > { %v539_v26 = vpop.eup %538  ;;  %v366_v27 = vadd.f32 1.0, %v537_v25 }
 0x187   : > { %v365_v28 = vadd.f32 1.0, %v539_v26 }
 0x188   : > { %544 = vrcp.f32 %v366_v27 }
 0x189   : > { %v541_v29 = vpop.eup %540  ;;  %546 = vrcp.f32 %v365_v28 }
 0x18a   : > { %v543_v30 = vpop.eup %542  ;;  %v368_v31 = vadd.f32 1.0, %v541_v29 }
 0x18b   : > { %v367_v32 = vadd.f32 1.0, %v543_v30 }
 0x18c   : > { %548 = vrcp.f32 %v368_v31 }
 0x18d   : > { %550 = vrcp.f32 %v367_v32 }
 0x192   : > { %v545_v33 = vpop.eup %544 }
 0x193   : > { %v547_v34 = vpop.eup %546  ;;  %379 = vst.msk [vmem:[%s207_s8 + $0x8] sm:$0xff] %vm377_vm1, %v545_v33 }
 0x194   : > { %378 = vst.msk [vmem:[%s207_s8] sm:$0xff] %vm377_vm1, %v547_v34 }
 0x196   : > { %v549_v35 = vpop.eup %548 }
 0x197   : > { %v551_v36 = vpop.eup %550  ;;  %381 = vst.msk [vmem:[%s207_s8 + $0x18] sm:$0xff] %vm377_vm1, %v549_v35 }
 0x198   : > { %380 = vst.msk [vmem:[%s207_s8 + $0x10] sm:$0xff] %vm377_vm1, %v551_v36 }
 0x199 PF: > { %s16_s17 = sadd.s32 1, %s632_s17   ;;  %s824_s12 = smov %s616_s13 }
 0x19a   : > { %p13_p9 = scmp.ge.s32.totalorder %s16_s17, 4   ;;  %s825_s13 = smov %s620_s14 }
 0x19b   : > { %s826_s14 = smov %s706_s24  ;;  %s827_s15 = smov %s628_s16 }
 0x19c   : > { %s828_s16 = smov %s830_s19  ;;  %15 = sbr.rel (!%p13_p9) target bundleno = 4 (0x4), region = 80 }
 0x1a3   :  { %403 = vsyncpa [#allocation5], 1 }
 0x1a4   :  { %405 = vsyncpa [#allocation5 + $0x1], 1 }

</bundles_post_ra>
